<compile_context>
chip_gen: v7x
topology: tpu7x:2x2x1
jax: 0.10.0
libtpu: 0.0.40
codegen_flags: <defaults>
</compile_context>

<pallas_src>
import math

import jax
import jax.numpy as jnp
from jax.experimental import pallas as pl
from jax.experimental.pallas import tpu as pltpu


def _flatten_dma_kernel(x_hbm_ref, o_hbm_ref, copy_sem):
    # Zero-compute memcpy: one direct HBM -> HBM DMA of the whole buffer.
    cp = pltpu.make_async_copy(x_hbm_ref, o_hbm_ref, copy_sem)
    cp.start()
    cp.wait()


def flatten_pallas(x, materialize=True):
    """Pallas equivalent of torch's `x.view(x.size(0), -1)` on a contiguous tensor."""
    if x.ndim < 1:
        raise ValueError("Flatten.forward expects a tensor with a batch dimension")

    B = x.shape[0]
    F = math.prod(x.shape[1:]) if x.ndim > 1 else 1
    N = B * F

    # torch .view shares storage — the metadata-only reshape is the faithful op.
    if not materialize or N == 0:
        return x.reshape(B, F)

    itemsize = jnp.dtype(x.dtype).itemsize

    out = pl.pallas_call(
        _flatten_dma_kernel,
        out_shape=jax.ShapeDtypeStruct(x.shape, x.dtype),
        in_specs=[pl.BlockSpec(memory_space=pl.ANY)],
        out_specs=pl.BlockSpec(memory_space=pl.ANY),
        scratch_shapes=[pltpu.SemaphoreType.DMA],
        cost_estimate=pl.CostEstimate(
            flops=0, transcendentals=0, bytes_accessed=2 * N * itemsize
        ),
    )(x)

    # Metadata-only view to (B, F); row-major order matches torch .view(B, -1).
    return out.reshape(B, F)


if __name__ == "__main__":
    key = jax.random.PRNGKey(0)

    # Small NCHW input consistent with the module's forward.
    B, C, H, W = 2, 4, 16, 16
    x = jax.random.normal(key, (B, C, H, W), dtype=jnp.float32)

    y = jax.block_until_ready(flatten_pallas(x))
    y_ref = x.reshape(B, -1)

    assert y.shape == (B, C * H * W), f"bad shape {y.shape}"
    assert y.dtype == x.dtype
    assert bool(jnp.array_equal(y, y_ref)), "flatten output mismatch"

    # Ragged (non-128-aligned) size: no padding path needed anymore.
    x2 = jax.random.normal(jax.random.PRNGKey(1), (2, 3, 5, 7), dtype=jnp.float32)
    y2 = jax.block_until_ready(flatten_pallas(x2))
    assert y2.shape == (2, 3 * 5 * 7)
    assert bool(jnp.array_equal(y2, x2.reshape(2, -1))), "ragged flatten mismatch"

    # Zero-copy path (what torch .view actually does).
    y3 = flatten_pallas(x, materialize=False)
    assert bool(jnp.array_equal(y3, y_ref))

    print("KERNEL_OK")
</pallas_src>

<mosaic_0001>
module attributes {stable_mosaic.version = 11 : i64} {
  func.func @_flatten_dma_kernel(%arg0: memref<2x4x16x16xf32, #tpu.memory_space<any>>, %arg1: memref<2x4x16x16xf32, #tpu.memory_space<any>>, %arg2: memref<!tpu.dma_semaphore, #tpu.memory_space<semaphore_mem>>) attributes {dimension_semantics = [], scalar_prefetch = 0 : i64, scratch_operands = 1 : i64, tpu.core_type = #tpu.core_type<tc>} {
    tpu.enqueue_dma source(%arg0 : memref<2x4x16x16xf32, #tpu.memory_space<any>>) target(%arg1 : memref<2x4x16x16xf32, #tpu.memory_space<any>>) target_semaphore(%arg2 : memref<!tpu.dma_semaphore, #tpu.memory_space<semaphore_mem>>)
    tpu.wait_dma2 semaphore(%arg2 : memref<!tpu.dma_semaphore, #tpu.memory_space<semaphore_mem>>) src(%arg0 : memref<2x4x16x16xf32, #tpu.memory_space<any>>) dst(%arg1 : memref<2x4x16x16xf32, #tpu.memory_space<any>>)
    return
  }
}

</mosaic_0001>

<bundles_post_ra>
// kernel: tpu_custom_call.1
= control target key start
LH: loop header
LB: loop body
LE: loop exit
PB: predicated region body
PF: predicated region fallthrough
CT: control target
= control target key end

     0   :  { %s36_s6 = smov [#allocation2]   ;;  %s37_s7 = smov [#allocation3]   ;;  %s55_s0 = inlined_call_operand.hbm [shape: f32[2,4,16,16], index: 0, kind: input, shape index: {}]   ;;  %s56_s1 = inlined_call_operand.hbm [shape: f32[2,4,16,16], index: 1, kind: output, shape index: {}]  }
   0x1   :  { %s38_s8 = smov 0  }
   0x2   :  { %18 = dma.general %s55_s0, 2048, %s56_s1, %s36_s6, %s37_s7, [#allocation4], %s38_s8, 0  }
   0x3   :  { %34 = dma.done.wait [#allocation2], 2048 }
   0x4   :  { %35 = vsyncadd [#allocation2], 4294965248 }
   0x5   :  { %24 = vsyncmov [#allocation2] }
   0x8   :  { %s25_s13 = vpop.sfrf %24 }
   0x9   :  { %p30_p0 = scmp.ne.s32.totalorder %s25_s13, 0 }
   0xb   :  { %29 = shalt.err (%p30_p0)  }

</bundles_post_ra>
